<compile_context>
chip_gen: v7x
topology: tpu7x:2x2x1
jax: 0.10.0
libtpu: 0.0.40
codegen_flags: <defaults>
</compile_context>

<pallas_src>
import functools

import jax
import jax.numpy as jnp
import numpy as np
from jax import lax
from jax.experimental import pallas as pl
from jax.experimental.pallas import tpu as pltpu

_LANES = 128
_STRIP_ROWS = 64                    # multiple of sublane quantum for f32/bf16/int8 (8/16/32)
_TARGET_BLOCK_BYTES = 2 << 20       # ~2 MiB per pipeline buffer (HBM-roofline sweet spot)
_MIN_SPLIT_BYTES = 512 << 10        # above this, force >=2 grid steps (v7x megacore)
_VMEM_LIMIT_BYTES = 32 * 1024 * 1024


def _i32(v):
    """Python int -> equivalent int32 value (two's-complement wrap)."""
    v &= 0xFFFFFFFF
    return v - (1 << 32) if v >= (1 << 31) else v


_PHI = _i32(0x9E3779B9)   # golden-ratio increment
_M1 = _i32(0x85EBCA6B)    # murmur3 fmix32 constants
_M2 = _i32(0xC2B2AE35)


def _mix32(x):
    """murmur3 fmix32 finalizer (bijective, strong avalanche) on int32 values."""
    x = x ^ lax.shift_right_logical(x, jnp.int32(16))
    x = x * jnp.int32(_M1)
    x = x ^ lax.shift_right_logical(x, jnp.int32(13))
    x = x * jnp.int32(_M2)
    x = x ^ lax.shift_right_logical(x, jnp.int32(16))
    return x


def _dropout_kernel(seed_ref, x_ref, out_ref, *, threshold, scale, block_rows, strip_rows):
    seed = seed_ref[0]                               # int32 scalar in SMEM
    base_row = pl.program_id(0) * block_rows         # global row offset of this block

    def do_strip(start, size):
        # Global element index of every lane in this strip (independent of tiling).
        r = lax.broadcasted_iota(jnp.int32, (size, _LANES), 0)
        c = lax.broadcasted_iota(jnp.int32, (size, _LANES), 1)
        idx = (base_row + start + r) * jnp.int32(_LANES) + c
        # Two hash rounds mixing seed + index -> ~uniform int32 bits in [-2^31, 2^31).
        h = _mix32(idx * jnp.int32(_PHI) + seed)
        h = _mix32(h ^ seed)
        x = x_ref[pl.ds(start, size), :]
        y = jnp.where(h < jnp.int32(threshold), x * scale, jnp.zeros_like(x))
        out_ref[pl.ds(start, size), :] = y.astype(out_ref.dtype)

    n_full = block_rows // strip_rows
    rem = block_rows - n_full * strip_rows
    if n_full > 0:
        def body(i, carry):
            do_strip(pl.multiple_of(i * strip_rows, strip_rows), strip_rows)
            return carry
        lax.fori_loop(0, n_full, body, jnp.int32(0))
    if rem > 0:
        do_strip(n_full * strip_rows, rem)


def my_dropout_forward(x, *, p, seed, training=True):
    """Pallas implementation of MyDropout.forward."""
    if p < 0.0 or p > 1.0:
        raise ValueError(
            "dropout probability has to be between 0 and 1, but got {}".format(p))
    if not training or p == 0.0:
        return x                                   # eval mode / p==0 is the identity
    keep_prob = 1.0 - p
    if keep_prob <= 0.0:
        # p == 1: everything is dropped (reference would produce 0 * inf = NaN).
        return jnp.zeros_like(x)
    scale = 1.0 / keep_prob
    # keep iff int32 hash bits < threshold; bits ~ uniform over [-2^31, 2^31).
    # Clamping at keep_prob -> 1 gives P(keep) = 1 - 2^-32 (negligible; p==0 special-cased).
    threshold = int(round(keep_prob * 2.0 ** 32)) - 2 ** 31
    threshold = max(min(threshold, 2 ** 31 - 1), -(2 ** 31))

    orig_shape = x.shape
    n = int(np.prod(orig_shape)) if orig_shape else 1
    itemsize = jnp.dtype(x.dtype).itemsize

    # Lane-dense (rows, 128) slab; pad only the ragged tail (< 128 elements).
    rows = -(-n // _LANES)
    padded = rows * _LANES
    flat = jnp.ravel(x)
    if padded != n:
        flat = jnp.pad(flat, (0, padded - n))
    x2 = flat.reshape(rows, _LANES)

    # Grid-step block size: ~2 MiB per buffer, multiple of the 64-row strip.
    rows_per_tile = max(
        _STRIP_ROWS,
        (_TARGET_BLOCK_BYTES // (_LANES * itemsize)) // _STRIP_ROWS * _STRIP_ROWS)
    if rows <= rows_per_tile:
        if rows * _LANES * itemsize >= _MIN_SPLIT_BYTES:
            # Mid-size input: use >=2 grid steps so the "parallel" axis can shard
            # across both TensorCores on v7x instead of collapsing to grid=(1,).
            half = -(-rows // 2)
            tr = -(-half // _STRIP_ROWS) * _STRIP_ROWS
        else:
            tr = rows            # single block equal to the full extent (always legal)
    else:
        tr = rows_per_tile
    grid = (pl.cdiv(rows, tr),)  # partial last block is masked by Pallas
    strip_rows = min(_STRIP_ROWS, tr)

    seed_arr = jnp.asarray([seed], dtype=jnp.int32)

    out2 = pl.pallas_call(
        functools.partial(_dropout_kernel, threshold=threshold, scale=scale,
                          block_rows=tr, strip_rows=strip_rows),
        out_shape=jax.ShapeDtypeStruct((rows, _LANES), x.dtype),
        grid_spec=pltpu.PrefetchScalarGridSpec(
            num_scalar_prefetch=1,               # seed lives in SMEM
            grid=grid,
            in_specs=[pl.BlockSpec((tr, _LANES), lambda i, s_ref: (i, 0))],
            out_specs=pl.BlockSpec((tr, _LANES), lambda i, s_ref: (i, 0)),
        ),
        compiler_params=pltpu.CompilerParams(
            dimension_semantics=("parallel",),
            vmem_limit_bytes=_VMEM_LIMIT_BYTES,
        ),
        cost_estimate=pl.CostEstimate(
            flops=3 * padded,
            transcendentals=0,
            bytes_accessed=2 * padded * itemsize + 4,
        ),
    )(seed_arr, x2)

    if padded != n:
        return out2.reshape(-1)[:n].reshape(orig_shape)
    return out2.reshape(orig_shape)


if __name__ == "__main__":
    key = jax.random.PRNGKey(0)
    P = 0.5
    # 2*4*16*16 = 2048 elements -> a single (16, 128) lane-dense slab, grid=(1,)
    x = jax.random.normal(key, (2, 4, 16, 16), jnp.float32)

    out = my_dropout_forward(x, p=P, seed=42, training=True)
    out = jax.block_until_ready(out)

    x_np = np.asarray(x)
    out_np = np.asarray(out)

    assert out_np.shape == x_np.shape
    assert np.all(np.isfinite(out_np))
    # Every output element is either dropped (exactly 0) or kept & rescaled by 1/(1-p).
    kept = np.isclose(out_np, x_np / (1.0 - P), rtol=1e-6, atol=1e-6)
    dropped = out_np == 0.0
    assert np.all(kept | dropped)
    # Keep fraction should be close to 1-p (2048 Bernoulli(0.5) draws).
    frac = float(kept.mean())
    assert 0.38 < frac < 0.62, frac

    # Eval mode is the identity, as in the reference module.
    out_eval = jax.block_until_ready(my_dropout_forward(x, p=P, seed=42, training=False))
    assert np.array_equal(np.asarray(out_eval), x_np)

    print("KERNEL_OK")
</pallas_src>

<mosaic_0001>
module attributes {stable_mosaic.version = 11 : i64} {
  func.func @_dropout_kernel(%arg0: i32, %arg1: memref<1xi32, #tpu.memory_space<smem>>, %arg2: memref<16x128xf32, #tpu.memory_space<vmem>>, %arg3: memref<16x128xf32, #tpu.memory_space<vmem>>) attributes {dimension_semantics = [#tpu.dimension_semantics<parallel>], iteration_bounds = array<i64: 1>, scalar_prefetch = 1 : i64, scratch_operands = 0 : i64, tpu.core_type = #tpu.core_type<tc>, window_params = [{transform_indices = @transform_0, window_bounds = array<i64: 16, 128>}, {transform_indices = @transform_1, window_bounds = array<i64: 16, 128>}]} {
    %c0 = arith.constant 0 : index
    %0 = memref.load %arg1[%c0] : memref<1xi32, #tpu.memory_space<smem>>
    %c16_i32 = arith.constant 16 : i32
    %1 = arith.muli %arg0, %c16_i32 : i32
    %c0_i32 = arith.constant 0 : i32
    %c16_i32_0 = arith.constant 16 : i32
    %2 = arith.muli %c0_i32, %c16_i32_0 : i32
    %3 = tpu.assume_multiple %2, 16 : i32
    %4 = tpu.iota {dimensions = array<i32: 0>} : vector<16x128xi32>
    %5 = tpu.iota {dimensions = array<i32: 1>} : vector<16x128xi32>
    %6 = arith.addi %1, %3 : i32
    %7 = vector.broadcast %6 : i32 to vector<16x128xi32>
    %8 = arith.addi %7, %4 : vector<16x128xi32>
    %c128_i32 = arith.constant 128 : i32
    %9 = vector.broadcast %c128_i32 : i32 to vector<16x128xi32>
    %10 = arith.muli %8, %9 : vector<16x128xi32>
    %11 = arith.addi %10, %5 : vector<16x128xi32>
    %c-1640531527_i32 = arith.constant -1640531527 : i32
    %12 = vector.broadcast %c-1640531527_i32 : i32 to vector<16x128xi32>
    %13 = arith.muli %11, %12 : vector<16x128xi32>
    %14 = vector.broadcast %0 : i32 to vector<16x128xi32>
    %15 = arith.addi %13, %14 : vector<16x128xi32>
    %c16_i32_1 = arith.constant 16 : i32
    %16 = vector.broadcast %c16_i32_1 : i32 to vector<16x128xi32>
    %17 = arith.shrui %15, %16 : vector<16x128xi32>
    %18 = arith.xori %15, %17 : vector<16x128xi32>
    %c-2048144789_i32 = arith.constant -2048144789 : i32
    %19 = vector.broadcast %c-2048144789_i32 : i32 to vector<16x128xi32>
    %20 = arith.muli %18, %19 : vector<16x128xi32>
    %c13_i32 = arith.constant 13 : i32
    %21 = vector.broadcast %c13_i32 : i32 to vector<16x128xi32>
    %22 = arith.shrui %20, %21 : vector<16x128xi32>
    %23 = arith.xori %20, %22 : vector<16x128xi32>
    %c-1028477387_i32 = arith.constant -1028477387 : i32
    %24 = vector.broadcast %c-1028477387_i32 : i32 to vector<16x128xi32>
    %25 = arith.muli %23, %24 : vector<16x128xi32>
    %c16_i32_2 = arith.constant 16 : i32
    %26 = vector.broadcast %c16_i32_2 : i32 to vector<16x128xi32>
    %27 = arith.shrui %25, %26 : vector<16x128xi32>
    %28 = arith.xori %25, %27 : vector<16x128xi32>
    %29 = vector.broadcast %0 : i32 to vector<16x128xi32>
    %30 = arith.xori %28, %29 : vector<16x128xi32>
    %c16_i32_3 = arith.constant 16 : i32
    %31 = vector.broadcast %c16_i32_3 : i32 to vector<16x128xi32>
    %32 = arith.shrui %30, %31 : vector<16x128xi32>
    %33 = arith.xori %30, %32 : vector<16x128xi32>
    %c-2048144789_i32_4 = arith.constant -2048144789 : i32
    %34 = vector.broadcast %c-2048144789_i32_4 : i32 to vector<16x128xi32>
    %35 = arith.muli %33, %34 : vector<16x128xi32>
    %c13_i32_5 = arith.constant 13 : i32
    %36 = vector.broadcast %c13_i32_5 : i32 to vector<16x128xi32>
    %37 = arith.shrui %35, %36 : vector<16x128xi32>
    %38 = arith.xori %35, %37 : vector<16x128xi32>
    %c-1028477387_i32_6 = arith.constant -1028477387 : i32
    %39 = vector.broadcast %c-1028477387_i32_6 : i32 to vector<16x128xi32>
    %40 = arith.muli %38, %39 : vector<16x128xi32>
    %c16_i32_7 = arith.constant 16 : i32
    %41 = vector.broadcast %c16_i32_7 : i32 to vector<16x128xi32>
    %42 = arith.shrui %40, %41 : vector<16x128xi32>
    %43 = arith.xori %40, %42 : vector<16x128xi32>
    %44 = arith.index_cast %3 : i32 to index
    %c0_8 = arith.constant 0 : index
    %45 = vector.load %arg2[%44, %c0_8] : memref<16x128xf32, #tpu.memory_space<vmem>>, vector<16x128xf32>
    %c0_i32_9 = arith.constant 0 : i32
    %46 = vector.broadcast %c0_i32_9 : i32 to vector<16x128xi32>
    %47 = arith.cmpi slt, %43, %46 : vector<16x128xi32>
    %cst = arith.constant 2.000000e+00 : f32
    %48 = vector.broadcast %cst : f32 to vector<16x128xf32>
    %49 = arith.mulf %45, %48 : vector<16x128xf32>
    %cst_10 = arith.constant 0.000000e+00 : f32
    %50 = vector.broadcast %cst_10 : f32 to vector<16x128xf32>
    %51 = arith.select %47, %49, %50 : vector<16x128xi1>, vector<16x128xf32>
    %52 = arith.index_cast %3 : i32 to index
    %c0_11 = arith.constant 0 : index
    %53 = vector.load %arg3[%52, %c0_11] : memref<16x128xf32, #tpu.memory_space<vmem>>, vector<16x128xf32>
    tpu.vector_store %arg3[%52, %c0_11], %51 {strides = array<i32>} : memref<16x128xf32, #tpu.memory_space<vmem>>, vector<16x128xf32>,
    %c1_i32 = arith.constant 1 : i32
    return
  }
  func.func @transform_0(%arg0: i32, %arg1: memref<1xi32, #tpu.memory_space<smem>>) -> (i32, i32) {
    %c0_i32 = arith.constant 0 : i32
    %c0_i32_0 = arith.constant 0 : i32
    return %arg0, %c0_i32 : i32, i32
  }
  func.func @transform_1(%arg0: i32, %arg1: memref<1xi32, #tpu.memory_space<smem>>) -> (i32, i32) {
    %c0_i32 = arith.constant 0 : i32
    %c0_i32_0 = arith.constant 0 : i32
    return %arg0, %c0_i32 : i32, i32
  }
}

</mosaic_0001>

<bundles_post_ra>
// kernel: tpu_custom_call.1
= control target key start
LH: loop header
LB: loop body
LE: loop exit
PB: predicated region body
PF: predicated region fallthrough
CT: control target
= control target key end

     0   :  { %8 = vsyncpa [#allocation5], 0  ;;  %s210_s0 = inlined_call_operand.<no memory space> [shape: s32[1], index: 0, kind: input, shape index: {}]   ;;  %s211_s1 = inlined_call_operand.hbm [shape: f32[16,128], index: 1, kind: input, shape index: {}]   ;;  %s212_s2 = inlined_call_operand.hbm [shape: f32[16,128], index: 2, kind: output, shape index: {}]  }
   0x1   :  { %9 = vsyncpa [#allocation6], 0  ;;  %s158_s9 = smov [#allocation4]   ;;  %s110_s13 = scalar_lea.hbm %s211_s1, 256 }
   0x2   :  { %s15_s10 = sshll.u32 %s158_s9, 4  ;;  %p111_p0 = scmp.ne.s32.totalorder %s211_s1, %s110_s13  ;;  %s16_s10 = int_to_ptr.vmem [resolvable:$true] %s15_s10 }
   0x3   :  { %p114_p1 = scmp.lt.u32.totalorder %s110_s13, %s211_s1 }
   0x5   :  { %p116_p2 = pnand %p114_p1, %p111_p0 }
   0x7   :  { %119 = shalt.err (!%p116_p2)
}
   0x8   :  { %s120_s18 = scalar_lea.vmem %s16_s10, 256  ;;  %p125_p4 = scmp.lt.s32.totalorder %s16_s10, %s16_s10 }
   0x9   :  { %p121_p3 = scmp.ne.s32.totalorder %s16_s10, %s120_s18  ;;  %p126_p5 = scmp.lt.s32.totalorder %s120_s18, %s120_s18 }
   0xb   :  { %p127_p6 = por %p126_p5, %p125_p4 }
   0xd   :  { %p128_p7 = pnand %p127_p6, %p121_p3 }
   0xf   :  { %131 = shalt.err (!%p128_p7)
}
  0x10   :  { %s159_s19 = smov 128   ;;  %s160_s20 = smov 8  }
  0x11   :  { %21 = dma.hbm_to_vmem [thread:$0]  %s211_s1, 256, %s16_s10, [#allocation5], %s159_s19, %s159_s19, %s160_s20  }
  0x12   :  { %154 = dma.done.wait [#allocation5], 256  }
  0x13   :  { %155 = vsyncadd [#allocation5], 4294967040  ;;  %v27_v0 = vlaneseq  ;;  %v42_v7 = vstv %s210_s0  ;;  %v79_v41 = vld [vmem:[#allocation4] sm:$0xff]  ;;  %v80_v45 = vld [vmem:[#allocation4 + $0x8] sm:$0xff]  ;;  %s161_s0 = smov [#allocation7]  }
  0x14   :  { %v83_v46 = vmul.f32 2.0, %v79_v41  ;;  %v84_v49 = vmul.f32 2.0, %v80_v45  ;;  %s94_s1 = sshll.u32 %s161_s0, 4  ;;  %s95_s1 = int_to_ptr.vmem [resolvable:$true] %s94_s1 }
  0x15   :  { %v28_v1 = vshrl.u32 %v27_v0, 7  ;;  %v31_v2 = vand.u32 127, %v27_v0  ;;  %s132_s25 = scalar_lea.vmem %s95_s1, 256  ;;  %p137_p9 = scmp.lt.s32.totalorder %s95_s1, %s95_s1 }
  0x16   :  { %p133_p8 = scmp.ne.s32.totalorder %s95_s1, %s132_s25  ;;  %p138_p10 = scmp.lt.s32.totalorder %s132_s25, %s132_s25 }
  0x17   :  { %v29_v3 = vadd.s32 8, %v28_v1  ;;  %v36_v4 = vmul.u32 128, %v28_v1 }
  0x18   :  { %p139_p11 = por %p138_p10, %p137_p9 }
  0x19   :  { %v37_v5 = vmul.u32 128, %v29_v3  ;;  %v38_v6 = vadd.s32 %v36_v4, %v31_v2 }
  0x1a   :  { %p140_p12 = pnand %p139_p11, %p133_p8 }
  0x1b   :  { %v39_v8 = vadd.s32 %v37_v5, %v31_v2  ;;  %v40_v9 = vmul.u32 2654435769, %v38_v6 }
  0x1d   :  { %v41_v10 = vmul.u32 2654435769, %v39_v8  ;;  %v43_v11 = vadd.s32 %v42_v7, %v40_v9 }
  0x1f   :  { %v44_v12 = vadd.s32 %v42_v7, %v41_v10  ;;  %v45_v13 = vshrl.u32 %v43_v11, 16 }
  0x21   :  { %v47_v14 = vxor.u32 %v45_v13, %v43_v11  ;;  %v46_v15 = vshrl.u32 %v44_v12, 16 }
  0x23   :  { %v49_v16 = vmul.u32 2246822507, %v47_v14  ;;  %v48_v17 = vxor.u32 %v46_v15, %v44_v12 }
  0x25   :  { %v51_v18 = vshrl.u32 %v49_v16, 13  ;;  %v50_v19 = vmul.u32 2246822507, %v48_v17 }
  0x27   :  { %v53_v20 = vxor.u32 %v51_v18, %v49_v16  ;;  %v52_v21 = vshrl.u32 %v50_v19, 13 }
  0x29   :  { %v55_v22 = vmul.u32 3266489909, %v53_v20  ;;  %v54_v23 = vxor.u32 %v52_v21, %v50_v19 }
  0x2b   :  { %v57_v24 = vshrl.u32 %v55_v22, 16  ;;  %v56_v25 = vmul.u32 3266489909, %v54_v23 }
  0x2d   :  { %v59_v26 = vxor.u32 %v57_v24, %v55_v22  ;;  %v58_v27 = vshrl.u32 %v56_v25, 16 }
  0x2f   :  { %v61_v28 = vxor.u32 %v59_v26, %v42_v7  ;;  %v60_v29 = vxor.u32 %v58_v27, %v56_v25 }
  0x31   :  { %v63_v30 = vshrl.u32 %v61_v28, 16  ;;  %v62_v31 = vxor.u32 %v60_v29, %v42_v7 }
  0x33   :  { %v65_v32 = vxor.u32 %v63_v30, %v61_v28  ;;  %v64_v33 = vshrl.u32 %v62_v31, 16 }
  0x35   :  { %v67_v34 = vmul.u32 2246822507, %v65_v32  ;;  %v66_v35 = vxor.u32 %v64_v33, %v62_v31 }
  0x37   :  { %v69_v36 = vshrl.u32 %v67_v34, 13  ;;  %v68_v37 = vmul.u32 2246822507, %v66_v35 }
  0x39   :  { %v71_v38 = vxor.u32 %v69_v36, %v67_v34  ;;  %v70_v39 = vshrl.u32 %v68_v37, 13 }
  0x3b   :  { %v73_v40 = vmul.u32 3266489909, %v71_v38  ;;  %v72_v42 = vxor.u32 %v70_v39, %v68_v37 }
  0x3d   :  { %v75_v43 = vshrl.u32 %v73_v40, 16  ;;  %v74_v44 = vmul.u32 3266489909, %v72_v42 }
  0x3f   :  { %v77_v47 = vxor.u32 %v75_v43, %v73_v40  ;;  %v76_v48 = vshrl.u32 %v74_v44, 16 }
  0x41   :  { %vm81_vm0 = vcmp.lt.s32.totalorder %v77_v47, 0  ;;  %v78_v50 = vxor.u32 %v76_v48, %v74_v44 }
  0x42   :  { %v85_v51 = vsel %vm81_vm0, %v83_v46, 0.0 }
  0x43   :  { %87 = vst [vmem:[#allocation7] sm:$0xff] %v85_v51  ;;  %vm82_vm1 = vcmp.lt.s32.totalorder %v78_v50, 0 }
  0x44   :  { %v86_v52 = vsel %vm82_vm1, %v84_v49, 0.0 }
  0x45   :  { %88 = vst [vmem:[#allocation7 + $0x8] sm:$0xff] %v86_v52 }
  0x46   :  { %143 = shalt.err (!%p140_p12)
}
  0x47   :  { %s144_s28 = scalar_lea.hbm %s212_s2, 256 }
  0x48   :  { %p145_p13 = scmp.ne.s32.totalorder %s212_s2, %s144_s28  ;;  %p148_p0 = scmp.lt.u32.totalorder %s144_s28, %s212_s2 }
  0x4a   :  { %p150_p1 = pnand %p148_p0, %p145_p13 }
  0x4c   :  { %153 = shalt.err (!%p150_p1)
}
  0x4d   :  { %100 = dma.vmem_to_hbm [thread:$0]  %s95_s1, 256, %s212_s2, [#allocation6], %s159_s19, %s159_s19, %s160_s20  }
  0x4e   :  { %156 = dma.done.wait [#allocation6], 256  }
  0x4f   :  { %157 = vsyncadd [#allocation6], 4294967040 }
  0x50   :  { %104 = vsyncpa [#allocation5], 1 }
  0x51   :  { %105 = vsyncpa [#allocation6], 1 }

</bundles_post_ra>
